<compile_context>
chip_gen: v5e
topology: v5e:2x2
jax: 0.10.0
libtpu: 0.0.40
codegen_flags: <defaults>
</compile_context>

<pallas_src>
import functools

import jax
import jax.numpy as jnp
from jax import lax
from jax.experimental import pallas as pl
from jax.experimental.pallas import tpu as pltpu

INPUT_DIM = 47
HIDDEN = 32
OUT_DIM = 1          # fixed by the module: nn.Linear(32, 1)
_LANE = 128
_TILE_CAP = 8192     # per-tile VMEM stays ~a few MiB double-buffered everywhere


def _cdiv(a: int, b: int) -> int:
    return -(-a // b)


def _round_up(a: int, b: int) -> int:
    return _cdiv(a, b) * b


def _default_batch_tile(B: int, cap: int = _TILE_CAP) -> int:
    """Right-size the lane-dense batch tile.

    * round up to the 128-lane granule (output block is (1, batch_tile)),
    * for batches that span >= 2 granules, split into >= 2 tiles so the
      "parallel" grid axis can be sharded across v7x's two TensorCores,
    * cap the tile so huge batches pipeline instead of blowing up VMEM.
    """
    b_min = _round_up(max(B, 1), _LANE)
    if b_min <= _LANE:
        return _LANE
    half = _round_up(_cdiv(b_min, 2), _LANE)
    return min(cap, half)


def _kernel(x_ref, w1_ref, b1_ref, w2_ref, b2_ref, w3t_ref, b3_ref, o_ref):
    """One batch tile of the MLP; logits written lane-dense as (1, bt)."""
    compute_dtype = w1_ref.dtype
    x = x_ref[...].astype(compute_dtype)                  # (bt, 47), cast in-kernel

    # Linear(47 -> 32) + ReLU (f32 MXU accumulation, f32 epilogue).
    h = jnp.dot(x, w1_ref[...], preferred_element_type=jnp.float32)
    h = jnp.maximum(h + b1_ref[...], 0.0)

    # Dropout(0.5): identity in eval mode.

    # Linear(32 -> 32) + ReLU.
    h = jnp.dot(h.astype(compute_dtype), w2_ref[...],
                preferred_element_type=jnp.float32)
    h = jnp.maximum(h + b2_ref[...], 0.0)

    # Dropout(0.5): identity in eval mode.

    # Linear(32 -> 1), produced directly in lane-dense (1, bt) orientation:
    #   o[0, b] = sum_k W3t[0, k] * h[b, k]
    o = lax.dot_general(w3t_ref[...], h.astype(compute_dtype),
                        (((1,), (1,)), ((), ())),
                        preferred_element_type=jnp.float32)
    o_ref[...] = (o + b3_ref[...]).astype(o_ref.dtype)    # (1, bt)


@functools.partial(jax.jit, static_argnames=("batch_tile", "compute_dtype"))
def _lcld_forward(x, w1, b1, w2, b2, w3, b3, *, batch_tile, compute_dtype):
    """Raw logits (B, 1) float32.  x: (B, 47) in its native dtype."""
    B = x.shape[0]
    n_tiles = _cdiv(B, batch_tile)
    B_pad = n_tiles * batch_tile

    # Pad only the batch axis (padded rows develop nonzero activations via the
    # biases; they are sliced off below, so the result is unchanged).
    x_p = x if B_pad == B else jnp.pad(x, ((0, B_pad - B), (0, 0)))

    w1c = w1.astype(compute_dtype)                        # (47, 32)
    w2c = w2.astype(compute_dtype)                        # (32, 32)
    w3t = w3.T.astype(compute_dtype)                      # (1, 32)
    b1f = b1.astype(jnp.float32)                          # (1, 32)
    b2f = b2.astype(jnp.float32)                          # (1, 32)
    b3f = b3.astype(jnp.float32)                          # (1, 1)

    full = lambda arr: pl.BlockSpec(arr.shape, lambda i: (0, 0))

    out = pl.pallas_call(
        _kernel,
        out_shape=jax.ShapeDtypeStruct((1, B_pad), jnp.float32),
        grid_spec=pltpu.PrefetchScalarGridSpec(
            num_scalar_prefetch=0,
            grid=(n_tiles,),
            in_specs=[
                # Native 47-wide x block: last dim equals the full array dim.
                pl.BlockSpec((batch_tile, INPUT_DIM), lambda i: (i, 0)),
                full(w1c), full(b1f), full(w2c), full(b2f), full(w3t), full(b3f),
            ],
            # Lane-dense output block: batch on the lane axis.
            out_specs=pl.BlockSpec((1, batch_tile), lambda i: (0, i)),
        ),
        compiler_params=pltpu.CompilerParams(
            dimension_semantics=("parallel",)),   # megacore-shardable on v7x
    )(x_p, w1c, b1f, w2c, b2f, w3t, b3f)

    return out[0, :B].reshape(B, OUT_DIM)


def lcld_net_pallas(x, params, *, task="classification",
                    batch_tile=None, compute_dtype=jnp.bfloat16):
    """x: (B, 47).  params: w1 (47,32), b1 (1,32), w2 (32,32), b2 (1,32),
    w3 (32,1), b3 (1,1).  Returns (B, 1) float32."""
    B, F = x.shape
    assert F == INPUT_DIM

    if task == "classification":
        # torch softmax over dim=1, which has size OUT_DIM == 1:
        # exp(o - o) / sum == 1.0 exactly for every finite logit -> the output
        # is a constant; skip the kernel (and all of its HBM traffic) entirely.
        return jnp.ones((B, OUT_DIM), jnp.float32)

    if batch_tile is None:
        batch_tile = _default_batch_tile(B)
    assert batch_tile % _LANE == 0   # lane-dense output block

    return _lcld_forward(x, params["w1"], params["b1"],
                         params["w2"], params["b2"],
                         params["w3"], params["b3"],
                         batch_tile=batch_tile, compute_dtype=compute_dtype)


def init_params(key):
    """Deterministic synthetic parameters (Kaiming-uniform-ish scale)."""
    ks = jax.random.split(key, 6)

    def lin(kw, kb, fan_in, fan_out):
        bound = 1.0 / jnp.sqrt(fan_in)
        w = jax.random.uniform(kw, (fan_in, fan_out), jnp.float32, -bound, bound)
        b = jax.random.uniform(kb, (1, fan_out), jnp.float32, -bound, bound)
        return w, b

    w1, b1 = lin(ks[0], ks[1], INPUT_DIM, HIDDEN)
    w2, b2 = lin(ks[2], ks[3], HIDDEN, HIDDEN)
    w3, b3 = lin(ks[4], ks[5], HIDDEN, OUT_DIM)
    return dict(w1=w1, b1=b1, w2=w2, b2=b2, w3=w3, b3=b3)


def lcld_net_ref(x, params, *, task="classification"):
    """Pure-JAX reference (eval-mode forward), full-precision matmuls."""
    dot = functools.partial(jnp.dot, precision=jax.lax.Precision.HIGHEST)
    h = jnp.maximum(dot(x, params["w1"]) + params["b1"], 0.0)
    h = jnp.maximum(dot(h, params["w2"]) + params["b2"], 0.0)
    o = dot(h, params["w3"]) + params["b3"]
    if task == "classification":
        o = jax.nn.softmax(o, axis=1)
    return o


if __name__ == "__main__":
    key = jax.random.PRNGKey(0)
    kx, kx2, kp = jax.random.split(key, 3)
    params = init_params(kp)

    # --- small batch (B=8): right-sized 128-row tile, single grid step -------
    B = 8
    x = jax.random.normal(kx, (B, INPUT_DIM), jnp.float32)

    # Headline path: classification (softmax over a size-1 axis == 1.0 exactly).
    out_cls = jax.block_until_ready(lcld_net_pallas(x, params, task="classification"))
    ref_cls = lcld_net_ref(x, params, task="classification")
    assert out_cls.shape == (B, OUT_DIM)
    assert jnp.allclose(out_cls, ref_cls, atol=1e-6), (out_cls, ref_cls)

    # Kernel math check via the regression path (no softmax).
    ref_reg = lcld_net_ref(x, params, task="regression")

    out_f32 = jax.block_until_ready(
        lcld_net_pallas(x, params, task="regression", compute_dtype=jnp.float32))
    assert jnp.allclose(out_f32, ref_reg, atol=1e-3, rtol=1e-3), (out_f32, ref_reg)

    out_bf16 = jax.block_until_ready(
        lcld_net_pallas(x, params, task="regression", compute_dtype=jnp.bfloat16))
    assert jnp.allclose(out_bf16, ref_reg, atol=5e-2, rtol=5e-2), (out_bf16, ref_reg)

    # --- non-multiple batch (B=300): exercises batch padding + 2-tile grid ---
    B2 = 300
    x2 = jax.random.normal(kx2, (B2, INPUT_DIM), jnp.float32)
    ref2 = lcld_net_ref(x2, params, task="regression")
    out2 = jax.block_until_ready(
        lcld_net_pallas(x2, params, task="regression", compute_dtype=jnp.float32))
    assert out2.shape == (B2, OUT_DIM)
    assert jnp.allclose(out2, ref2, atol=1e-3, rtol=1e-3), (out2, ref2)

    print("KERNEL_OK")
</pallas_src>

<mosaic_0001>
module attributes {stable_mosaic.version = 11 : i64} {
  func.func @_kernel(%arg0: i32, %arg1: memref<128x47xf32, #tpu.memory_space<vmem>>, %arg2: memref<47x32xf32, #tpu.memory_space<vmem>>, %arg3: memref<1x32xf32, #tpu.memory_space<vmem>>, %arg4: memref<32x32xf32, #tpu.memory_space<vmem>>, %arg5: memref<1x32xf32, #tpu.memory_space<vmem>>, %arg6: memref<1x32xf32, #tpu.memory_space<vmem>>, %arg7: memref<1x1xf32, #tpu.memory_space<vmem>>, %arg8: memref<1x128xf32, #tpu.memory_space<vmem>>) attributes {dimension_semantics = [#tpu.dimension_semantics<parallel>], iteration_bounds = array<i64: 1>, scalar_prefetch = 0 : i64, scratch_operands = 0 : i64, tpu.core_type = #tpu.core_type<tc>, window_params = [{transform_indices = @transform_0, window_bounds = array<i64: 128, 47>}, {pipeline_mode = #tpu.pipeline_mode<synchronous>, transform_indices = @transform_1, window_bounds = array<i64: 47, 32>}, {pipeline_mode = #tpu.pipeline_mode<synchronous>, transform_indices = @transform_2, window_bounds = array<i64: 1, 32>}, {pipeline_mode = #tpu.pipeline_mode<synchronous>, transform_indices = @transform_3, window_bounds = array<i64: 32, 32>}, {pipeline_mode = #tpu.pipeline_mode<synchronous>, transform_indices = @transform_4, window_bounds = array<i64: 1, 32>}, {pipeline_mode = #tpu.pipeline_mode<synchronous>, transform_indices = @transform_5, window_bounds = array<i64: 1, 32>}, {pipeline_mode = #tpu.pipeline_mode<synchronous>, transform_indices = @transform_6, window_bounds = array<i64: 1, 1>}, {transform_indices = @transform_7, window_bounds = array<i64: 1, 128>}]} {
    %c0 = arith.constant 0 : index
    %c0_0 = arith.constant 0 : index
    %0 = vector.load %arg1[%c0, %c0_0] : memref<128x47xf32, #tpu.memory_space<vmem>>, vector<128x47xf32>
    %c0_1 = arith.constant 0 : index
    %c0_2 = arith.constant 0 : index
    %1 = vector.load %arg2[%c0_1, %c0_2] : memref<47x32xf32, #tpu.memory_space<vmem>>, vector<47x32xf32>
    %cst = arith.constant dense<0.000000e+00> : vector<128x32xf32>
    %2 = tpu.matmul %0, %1, %cst {dimension_numbers = #tpu.dot_dimension_numbers<[1], [0], [0], [1], [0, 0, 1, 1], [], []>} : vector<128x47xf32>, vector<47x32xf32>, vector<128x32xf32> -> vector<128x32xf32>
    %c0_3 = arith.constant 0 : index
    %c0_4 = arith.constant 0 : index
    %3 = vector.load %arg3[%c0_3, %c0_4] : memref<1x32xf32, #tpu.memory_space<vmem>>, vector<1x32xf32>
    %4 = vector.broadcast %3 : vector<1x32xf32> to vector<128x32xf32>
    %5 = arith.addf %2, %4 : vector<128x32xf32>
    %cst_5 = arith.constant 0.000000e+00 : f32
    %6 = vector.broadcast %cst_5 : f32 to vector<128x32xf32>
    %7 = arith.maximumf %5, %6 : vector<128x32xf32>
    %c0_6 = arith.constant 0 : index
    %c0_7 = arith.constant 0 : index
    %8 = vector.load %arg4[%c0_6, %c0_7] : memref<32x32xf32, #tpu.memory_space<vmem>>, vector<32x32xf32>
    %cst_8 = arith.constant dense<0.000000e+00> : vector<128x32xf32>
    %9 = tpu.matmul %7, %8, %cst_8 {dimension_numbers = #tpu.dot_dimension_numbers<[1], [0], [0], [1], [0, 0, 1, 1], [], []>} : vector<128x32xf32>, vector<32x32xf32>, vector<128x32xf32> -> vector<128x32xf32>
    %c0_9 = arith.constant 0 : index
    %c0_10 = arith.constant 0 : index
    %10 = vector.load %arg5[%c0_9, %c0_10] : memref<1x32xf32, #tpu.memory_space<vmem>>, vector<1x32xf32>
    %11 = vector.broadcast %10 : vector<1x32xf32> to vector<128x32xf32>
    %12 = arith.addf %9, %11 : vector<128x32xf32>
    %cst_11 = arith.constant 0.000000e+00 : f32
    %13 = vector.broadcast %cst_11 : f32 to vector<128x32xf32>
    %14 = arith.maximumf %12, %13 : vector<128x32xf32>
    %c0_12 = arith.constant 0 : index
    %c0_13 = arith.constant 0 : index
    %15 = vector.load %arg6[%c0_12, %c0_13] : memref<1x32xf32, #tpu.memory_space<vmem>>, vector<1x32xf32>
    %cst_14 = arith.constant dense<0.000000e+00> : vector<1x128xf32>
    %16 = tpu.matmul %15, %14, %cst_14 {dimension_numbers = #tpu.dot_dimension_numbers<[1], [1], [0], [0], [0, 0, 1, 0], [], []>} : vector<1x32xf32>, vector<128x32xf32>, vector<1x128xf32> -> vector<1x128xf32>
    %c0_15 = arith.constant 0 : index
    %c0_16 = arith.constant 0 : index
    %17 = vector.load %arg7[%c0_15, %c0_16] : memref<1x1xf32, #tpu.memory_space<vmem>>, vector<1x1xf32>
    %18 = vector.broadcast %17 : vector<1x1xf32> to vector<1x128xf32>
    %19 = arith.addf %16, %18 : vector<1x128xf32>
    %c0_17 = arith.constant 0 : index
    %c0_18 = arith.constant 0 : index
    %20 = vector.load %arg8[%c0_17, %c0_18] : memref<1x128xf32, #tpu.memory_space<vmem>>, vector<1x128xf32>
    tpu.vector_store %arg8[%c0_17, %c0_18], %19 {strides = array<i32>} : memref<1x128xf32, #tpu.memory_space<vmem>>, vector<1x128xf32>,
    return
  }
  func.func @transform_0(%arg0: i32) -> (i32, i32) {
    %c0_i32 = arith.constant 0 : i32
    %c0_i32_0 = arith.constant 0 : i32
    return %arg0, %c0_i32 : i32, i32
  }
  func.func @transform_1(%arg0: i32) -> (i32, i32) {
    %c0_i32 = arith.constant 0 : i32
    %c0_i32_0 = arith.constant 0 : i32
    %c0_i32_1 = arith.constant 0 : i32
    return %c0_i32, %c0_i32_0 : i32, i32
  }
  func.func @transform_2(%arg0: i32) -> (i32, i32) {
    %c0_i32 = arith.constant 0 : i32
    %c0_i32_0 = arith.constant 0 : i32
    %c0_i32_1 = arith.constant 0 : i32
    return %c0_i32, %c0_i32_0 : i32, i32
  }
  func.func @transform_3(%arg0: i32) -> (i32, i32) {
    %c0_i32 = arith.constant 0 : i32
    %c0_i32_0 = arith.constant 0 : i32
    %c0_i32_1 = arith.constant 0 : i32
    return %c0_i32, %c0_i32_0 : i32, i32
  }
  func.func @transform_4(%arg0: i32) -> (i32, i32) {
    %c0_i32 = arith.constant 0 : i32
    %c0_i32_0 = arith.constant 0 : i32
    %c0_i32_1 = arith.constant 0 : i32
    return %c0_i32, %c0_i32_0 : i32, i32
  }
  func.func @transform_5(%arg0: i32) -> (i32, i32) {
    %c0_i32 = arith.constant 0 : i32
    %c0_i32_0 = arith.constant 0 : i32
    %c0_i32_1 = arith.constant 0 : i32
    return %c0_i32, %c0_i32_0 : i32, i32
  }
  func.func @transform_6(%arg0: i32) -> (i32, i32) {
    %c0_i32 = arith.constant 0 : i32
    %c0_i32_0 = arith.constant 0 : i32
    %c0_i32_1 = arith.constant 0 : i32
    return %c0_i32, %c0_i32_0 : i32, i32
  }
  func.func @transform_7(%arg0: i32) -> (i32, i32) {
    %c0_i32 = arith.constant 0 : i32
    %c0_i32_0 = arith.constant 0 : i32
    return %c0_i32, %arg0 : i32, i32
  }
}

</mosaic_0001>

<bundles_post_ra>
// kernel: _lcld_forward.1
= control target key start
LH: loop header
LB: loop body
LE: loop exit
PB: predicated region body
PF: predicated region fallthrough
CT: control target
= control target key end

     0   :  { %vm103_vm0 = vcmask 1046528   ;;  %vm54_vm1 = vcmask 384000   ;;  %vm196_vm2 = vcmask 261120   ;;  %s667_s1 = inlined_call_operand.vmem [shape: f32[47,32], index: 1, kind: input, shape index: {}]   ;;  %s668_s2 = inlined_call_operand.vmem [shape: f32[1,32], index: 2, kind: input, shape index: {}]   ;;  %s669_s0 = inlined_call_operand.vmem [shape: f32[128,47], index: 0, kind: input, shape index: {}]   ;;  %s670_s3 = inlined_call_operand.vmem [shape: f32[32,32], index: 3, kind: input, shape index: {}]   ;;  %s671_s4 = inlined_call_operand.vmem [shape: f32[1,32], index: 4, kind: input, shape index: {}]   ;;  %s672_s6 = inlined_call_operand.<no memory space> [shape: f32[1,1], index: 6, kind: input, shape index: {}]   ;;  %s673_s5 = inlined_call_operand.vmem [shape: f32[1,32], index: 5, kind: input, shape index: {}]   ;;  %s674_s7 = inlined_call_operand.vmem [shape: f32[1,128], index: 7, kind: output, shape index: {}]  }
   0x1   :  { %v49_v0 = vld [vmem:[%s667_s1 + $0x28] sm:$0x7f]  ;;  %v48_v1 = vld [vmem:[%s667_s1 + $0x20] sm:$0xff]  ;;  %v47_v2 = vld [vmem:[%s667_s1 + $0x18] sm:$0xff] }
   0x2   :  { %410 = vmatpush.msk.msra.mxu0 %vm103_vm0, %v49_v0  ;;  %460 = vmatpush.msk.msra.mxu3 %vm103_vm0, %v49_v0  ;;  %v46_v3 = vld [vmem:[%s667_s1 + $0x10] sm:$0xff]  ;;  %v45_v4 = vld [vmem:[%s667_s1 + $0x8] sm:$0xff]  ;;  %v44_v5 = vld [vmem:[%s667_s1] sm:$0xff] }
   0x3   :  { %v28_v6 = vld [vmem:[%s669_s0] sm:$0xff]  ;;  %v37_v7 = vld [vmem:[%s669_s0 + $0x48] sm:$0xff]  ;;  %v38_v9 = vld [vmem:[%s669_s0 + $0x50] sm:$0xff] }
   0x4   :  { %118 = vmatpush.msra.mxu0 %v48_v1  ;;  %461 = vmatpush.msra.mxu3 %v48_v1  ;;  %v29_v8 = vld [vmem:[%s669_s0 + $0x8] sm:$0xff]  ;;  %v30_v10 = vld [vmem:[%s669_s0 + $0x10] sm:$0xff]  ;;  %v39_v11 = vld [vmem:[%s669_s0 + $0x58] sm:$0xff] }
   0x5   :  { %v31_v12 = vld [vmem:[%s669_s0 + $0x18] sm:$0xff]  ;;  %v40_v13 = vld [vmem:[%s669_s0 + $0x60] sm:$0xff]  ;;  %v41_v15 = vld [vmem:[%s669_s0 + $0x68] sm:$0xff] }
   0x6   :  { %119 = vmatpush.msra.mxu0 %v47_v2  ;;  %462 = vmatpush.msra.mxu3 %v47_v2  ;;  %v32_v14 = vld [vmem:[%s669_s0 + $0x20] sm:$0xff]  ;;  %v191_v16 = vld [vmem:[%s670_s3 + $0x18] sm:$0xff]  ;;  %v33_v17 = vld [vmem:[%s669_s0 + $0x28] sm:$0xff] }
   0x7   :  { %257 = vmatpush.msra.mxu1 %v191_v16  ;;  %466 = vmatpush.msra.mxu2 %v191_v16  ;;  %v42_v18 = vld [vmem:[%s669_s0 + $0x70] sm:$0xff]  ;;  %v43_v20 = vld [vmem:[%s669_s0 + $0x78] sm:$0xff]  ;;  %v36_v22 = vld [vmem:[%s669_s0 + $0x40] sm:$0xff] }
   0x8   :  { %120 = vmatpush.msra.mxu0 %v46_v3  ;;  %463 = vmatpush.msra.mxu3 %v46_v3  ;;  %v34_v19 = vld [vmem:[%s669_s0 + $0x30] sm:$0xff]  ;;  %v35_v21 = vld [vmem:[%s669_s0 + $0x38] sm:$0xff]  ;;  %v189_v24 = vld [vmem:[%s670_s3 + $0x8] sm:$0xff] }
   0x9   :  { %v190_v23 = vld [vmem:[%s670_s3 + $0x10] sm:$0xff]  ;;  %v188_v25 = vld [vmem:[%s670_s3] sm:$0xff] }
   0xa   :  { %121 = vmatpush.msra.mxu0 %v45_v4  ;;  %464 = vmatpush.msra.mxu3 %v45_v4  ;;  %v476_v26 = vld [vmem:[%s668_s2] ss:$0 sm:$0xff] }
   0xb   :  { %258 = vmatpush.msra.mxu1 %v190_v23  ;;  %468 = vmatpush.msra.mxu2 %v190_v23 }
   0xc   :  { %122 = vmatpush.msra.mxu0 %v44_v5  ;;  %465 = vmatpush.msra.mxu3 %v44_v5 }
   0xd   :  { %411 = vmatmul.msk.f32.vlgmr.msra.gmra.mxu0 %vm54_vm1, %v28_v6  ;;  %420 = vmatmul.msk.f32.vlgmr.msra.gmra.mxu3 %vm54_vm1, %v37_v7 }
   0xe   :  { %467 = vmatpush.msrb.mxu3 %v191_v16  ;;  %259 = vmatpush.msra.mxu1 %v189_v24 }
   0xf   :  { %470 = vmatpush.msra.mxu2 %v189_v24 }
  0x10   :  { %469 = vmatpush.msrb.mxu3 %v190_v23  ;;  %260 = vmatpush.msra.mxu1 %v188_v25 }
  0x11   :  { %472 = vmatpush.msra.mxu2 %v188_v25 }
  0x12   :  { %471 = vmatpush.msrb.mxu3 %v189_v24 }
  0x14   :  { %473 = vmatpush.msrb.mxu3 %v188_v25 }
  0x15   :  { %412 = vmatmul.msk.f32.gmra.mxu0 %vm54_vm1, %v29_v8  ;;  %421 = vmatmul.msk.f32.gmra.mxu3 %vm54_vm1, %v38_v9 }
  0x1d   :  { %413 = vmatmul.msk.f32.gmra.mxu0 %vm54_vm1, %v30_v10  ;;  %422 = vmatmul.msk.f32.gmra.mxu3 %vm54_vm1, %v39_v11 }
  0x25   :  { %414 = vmatmul.msk.f32.gmra.mxu0 %vm54_vm1, %v31_v12  ;;  %423 = vmatmul.msk.f32.gmra.mxu3 %vm54_vm1, %v40_v13 }
  0x2d   :  { %415 = vmatmul.msk.f32.gmra.mxu0 %vm54_vm1, %v32_v14  ;;  %424 = vmatmul.msk.f32.gmra.mxu3 %vm54_vm1, %v41_v15 }
  0x35   :  { %416 = vmatmul.msk.f32.gmra.mxu0 %vm54_vm1, %v33_v17  ;;  %425 = vmatmul.msk.f32.gmra.mxu3 %vm54_vm1, %v42_v18 }
  0x3d   :  { %417 = vmatmul.msk.f32.gmra.mxu0 %vm54_vm1, %v34_v19  ;;  %426 = vmatmul.msk.f32.gmra.mxu3 %vm54_vm1, %v43_v20 }
  0x45   :  { %418 = vmatmul.msk.f32.gmra.mxu0 %vm54_vm1, %v35_v21 }
  0x4d   :  { %419 = vmatmul.msk.f32.gmra.mxu0 %vm54_vm1, %v36_v22  ;;  %v477_v22 = vld [vmem:[%s671_s4] ss:$0 sm:$0xff] }
  0x8a   :  { %v124_v27 = vpop.f32.mrf.mxu0 }
  0x8b   :  { %v125_v28 = vadd.f32 %v476_v26, %v124_v27 }
  0x8d   :  { %v172_v29 = vmax.f32 %v125_v28, 0.0 }
  0x8f   :  { %427 = vmatmul.msk.f32.vlgmr.msra.gmra.mxu1 %vm196_vm2, %v172_v29 }
  0x90   :  { %v151_v30 = vpop.f32.mrf.mxu3 }
  0x91   :  { %v152_v31 = vadd.f32 %v476_v26, %v151_v30 }
  0x92   :  { %v127_v32 = vpop.f32.mrf.mxu0 }
  0x93   :  { %v128_v33 = vadd.f32 %v476_v26, %v127_v32  ;;  %v181_v10 = vmax.f32 %v152_v31, 0.0 }
  0x95   :  { %v173_v34 = vmax.f32 %v128_v33, 0.0 }
  0x97   :  { %428 = vmatmul.msk.f32.gmra.mxu1 %vm196_vm2, %v173_v34 }
  0x98   :  { %v154_v35 = vpop.f32.mrf.mxu3 }
  0x99   :  { %v155_v36 = vadd.f32 %v476_v26, %v154_v35 }
  0x9a   :  { %v130_v37 = vpop.f32.mrf.mxu0 }
  0x9b   :  { %v182_v38 = vmax.f32 %v155_v36, 0.0  ;;  %v131_v39 = vadd.f32 %v476_v26, %v130_v37 }
  0x9d   :  { %v174_v40 = vmax.f32 %v131_v39, 0.0  ;;  %437 = vmatmul.msk.f32.vlgmr.msra.gmra.mxu2 %vm196_vm2, %v182_v38 }
  0x9f   :  { %429 = vmatmul.msk.f32.gmra.mxu1 %vm196_vm2, %v174_v40 }
  0xa0   :  { %v157_v41 = vpop.f32.mrf.mxu3 }
  0xa1   :  { %v158_v42 = vadd.f32 %v476_v26, %v157_v41 }
  0xa2   :  { %v133_v43 = vpop.f32.mrf.mxu0 }
  0xa3   :  { %v183_v44 = vmax.f32 %v158_v42, 0.0  ;;  %v134_v45 = vadd.f32 %v476_v26, %v133_v43 }
  0xa5   :  { %v175_v46 = vmax.f32 %v134_v45, 0.0  ;;  %438 = vmatmul.msk.f32.gmra.mxu2 %vm196_vm2, %v183_v44 }
  0xa7   :  { %430 = vmatmul.msk.f32.gmra.mxu1 %vm196_vm2, %v175_v46 }
  0xa8   :  { %v160_v47 = vpop.f32.mrf.mxu3 }
  0xa9   :  { %v161_v48 = vadd.f32 %v476_v26, %v160_v47  ;;  %v12_v47 = vstv %s672_s6 }
  0xaa   :  { %v136_v49 = vpop.f32.mrf.mxu0  ;;  %13 = vst [vmem:[#allocation2] sm:$0x1] %v12_v47 }
  0xab   :  { %v184_v50 = vmax.f32 %v161_v48, 0.0  ;;  %v137_v51 = vadd.f32 %v476_v26, %v136_v49  ;;  %v478_v48 = vmov 0  }
  0xac   :  { %475 = vset.pattern.permute.xlu0 %v478_v48 }
  0xad   :  { %v176_v52 = vmax.f32 %v137_v51, 0.0  ;;  %439 = vmatmul.msk.f32.gmra.mxu2 %vm196_vm2, %v184_v50 }
  0xaf   :  { %431 = vmatmul.msk.f32.gmra.mxu1 %vm196_vm2, %v176_v52 }
  0xb0   :  { %v163_v53 = vpop.f32.mrf.mxu3 }
  0xb1   :  { %v164_v54 = vadd.f32 %v476_v26, %v163_v53  ;;  %v327_v53 = vld [vmem:[#allocation2] sm:$0x1] }
  0xb2   :  { %v139_v55 = vpop.f32.mrf.mxu0  ;;  %330 = vperm.xlu0 %475, %v327_v53  }
  0xb3   :  { %v185_v56 = vmax.f32 %v164_v54, 0.0  ;;  %v140_v57 = vadd.f32 %v476_v26, %v139_v55 }
  0xb5   :  { %v177_v58 = vmax.f32 %v140_v57, 0.0  ;;  %440 = vmatmul.msk.f32.gmra.mxu2 %vm196_vm2, %v185_v56 }
  0xb7   :  { %432 = vmatmul.msk.f32.gmra.mxu1 %vm196_vm2, %v177_v58 }
  0xb8   :  { %v166_v59 = vpop.f32.mrf.mxu3 }
  0xb9   :  { %v167_v60 = vadd.f32 %v476_v26, %v166_v59 }
  0xba   :  { %v142_v61 = vpop.f32.mrf.mxu0 }
  0xbb   :  { %v186_v62 = vmax.f32 %v167_v60, 0.0  ;;  %v143_v63 = vadd.f32 %v476_v26, %v142_v61 }
  0xbd   :  { %v178_v0 = vmax.f32 %v143_v63, 0.0  ;;  %441 = vmatmul.msk.f32.gmra.mxu2 %vm196_vm2, %v186_v62  ;;  %v326_v63 = vld [vmem:[%s673_s5] sm:$0x1] }
  0xbf   :  { %433 = vmatmul.msk.f32.gmra.mxu1 %vm196_vm2, %v178_v0 }
  0xc0   :  { %v169_v1 = vpop.f32.mrf.mxu3 }
  0xc1   :  { %v170_v2 = vadd.f32 %v476_v26, %v169_v1 }
  0xc2   :  { %v145_v3 = vpop.f32.mrf.mxu0 }
  0xc3   :  { %v187_v4 = vmax.f32 %v170_v2, 0.0  ;;  %v146_v5 = vadd.f32 %v476_v26, %v145_v3 }
  0xc5   :  { %v179_v6 = vmax.f32 %v146_v5, 0.0  ;;  %442 = vmatmul.msk.f32.vlgmr.msrb.gmra.mxu3 %vm196_vm2, %v187_v4 }
  0xc7   :  { %434 = vmatmul.msk.f32.gmra.mxu1 %vm196_vm2, %v179_v6 }
  0xca   :  { %v148_v7 = vpop.f32.mrf.mxu0 }
  0xcb   :  { %v149_v8 = vadd.f32 %v476_v26, %v148_v7 }
  0xcd   :  { %v180_v9 = vmax.f32 %v149_v8, 0.0 }
  0xcf   :  { %435 = vmatmul.msk.f32.gmra.mxu1 %vm196_vm2, %v180_v9 }
  0xd7   :  { %436 = vmatmul.msk.f32.gmra.mxu1 %vm196_vm2, %v181_v10 }
 0x10c   :  { %v632_v11 = vpop.f32.mrf.mxu1 }
 0x10d   :  { %v263_v60 = vadd.f32 %v477_v22, %v632_v11 }
 0x10f   :  { %v310_v62 = vmax.f32 %v263_v60, 0.0 }
 0x114   :  { %v634_v12 = vpop.f32.mrf.mxu1 }
 0x115   :  { %v266_v58 = vadd.f32 %v477_v22, %v634_v12 }
 0x117   :  { %v311_v61 = vmax.f32 %v266_v58, 0.0 }
 0x11c   :  { %v268_v13 = vpop.f32.mrf.mxu1 }
 0x11d   :  { %v269_v56 = vadd.f32 %v477_v22, %v268_v13 }
 0x11f   :  { %v312_v59 = vmax.f32 %v269_v56, 0.0 }
 0x120   :  { %v292_v14 = vpop.f32.mrf.mxu2 }
 0x121   :  { %v293_v36 = vadd.f32 %v477_v22, %v292_v14 }
 0x123   :  { %v320_v39 = vmax.f32 %v293_v36, 0.0 }
 0x124   :  { %v271_v15 = vpop.f32.mrf.mxu1  ;;  %v331_v0 = vpop.permute.xlu0 %330 }
 0x125   :  { %v272_v54 = vadd.f32 %v477_v22, %v271_v15  ;;  %v333_v1 = vperm.slane %v331_v0, 0 }
 0x127   :  { %v313_v57 = vmax.f32 %v272_v54, 0.0 }
 0x128   :  { %v295_v16 = vpop.f32.mrf.mxu2 }
 0x129   :  { %v296_v34 = vadd.f32 %v477_v22, %v295_v16 }
 0x12b   :  { %v321_v37 = vmax.f32 %v296_v34, 0.0 }
 0x12c   :  { %v274_v17 = vpop.f32.mrf.mxu1 }
 0x12d   :  { %v275_v51 = vadd.f32 %v477_v22, %v274_v17 }
 0x12f   :  { %v314_v55 = vmax.f32 %v275_v51, 0.0 }
 0x130   :  { %v298_v18 = vpop.f32.mrf.mxu2 }
 0x131   :  { %v299_v32 = vadd.f32 %v477_v22, %v298_v18 }
 0x133   :  { %v322_v35 = vmax.f32 %v299_v32, 0.0 }
 0x134   :  { %v277_v19 = vpop.f32.mrf.mxu1 }
 0x135   :  { %v278_v49 = vadd.f32 %v477_v22, %v277_v19 }
 0x137   :  { %v315_v52 = vmax.f32 %v278_v49, 0.0 }
 0x138   :  { %v301_v20 = vpop.f32.mrf.mxu2 }
 0x139   :  { %v302_v29 = vadd.f32 %v477_v22, %v301_v20 }
 0x13b   :  { %v323_v33 = vmax.f32 %v302_v29, 0.0 }
 0x13c   :  { %v280_v21 = vpop.f32.mrf.mxu1 }
 0x13d   :  { %v281_v45 = vadd.f32 %v477_v22, %v280_v21 }
 0x13f   :  { %v316_v50 = vmax.f32 %v281_v45, 0.0 }
 0x140   :  { %v304_v23 = vpop.f32.mrf.mxu2 }
 0x141   :  { %v305_v27 = vadd.f32 %v477_v22, %v304_v23 }
 0x143   :  { %v324_v30 = vmax.f32 %v305_v27, 0.0 }
 0x144   :  { %v283_v24 = vpop.f32.mrf.mxu1 }
 0x145   :  { %v284_v43 = vadd.f32 %v477_v22, %v283_v24 }
 0x147   :  { %v317_v46 = vmax.f32 %v284_v43, 0.0 }
 0x148   :  { %v307_v25 = vpop.f32.mrf.mxu3 }
 0x149   :  { %v308_v26 = vadd.f32 %v477_v22, %v307_v25 }
 0x14b   :  { %v325_v28 = vmax.f32 %v308_v26, 0.0 }
 0x14c   :  { %v286_v31 = vpop.f32.mrf.mxu1 }
 0x14d   :  { %443 = vmatpush.xpose.msk.msrb.mxu2 %vm196_vm2, %v325_v28  ;;  %v287_v41 = vadd.f32 %v477_v22, %v286_v31 }
 0x14f   :  { %v318_v44 = vmax.f32 %v287_v41, 0.0 }
 0x151   :  { %444 = vmatpush.xpose.msk.msrb.mxu2 %vm196_vm2, %v324_v30 }
 0x154   :  { %v289_v38 = vpop.f32.mrf.mxu1 }
 0x155   :  { %445 = vmatpush.xpose.msk.msrb.mxu2 %vm196_vm2, %v323_v33  ;;  %v290_v40 = vadd.f32 %v477_v22, %v289_v38 }
 0x157   :  { %v319_v42 = vmax.f32 %v290_v40, 0.0 }
 0x159   :  { %446 = vmatpush.xpose.msk.msrb.mxu2 %vm196_vm2, %v322_v35 }
 0x15d   :  { %447 = vmatpush.xpose.msk.msrb.mxu2 %vm196_vm2, %v321_v37 }
 0x161   :  { %448 = vmatpush.xpose.msk.msrb.mxu2 %vm196_vm2, %v320_v39 }
 0x165   :  { %449 = vmatpush.xpose.msk.msrb.mxu2 %vm196_vm2, %v319_v42 }
 0x169   :  { %450 = vmatpush.xpose.msk.msrb.mxu2 %vm196_vm2, %v318_v44 }
 0x16d   :  { %451 = vmatpush.xpose.msk.msrb.mxu2 %vm196_vm2, %v317_v46 }
 0x171   :  { %452 = vmatpush.xpose.msk.msrb.mxu2 %vm196_vm2, %v316_v50 }
 0x175   :  { %453 = vmatpush.xpose.msk.msrb.mxu2 %vm196_vm2, %v315_v52 }
 0x179   :  { %454 = vmatpush.xpose.msk.msrb.mxu2 %vm196_vm2, %v314_v55 }
 0x17d   :  { %455 = vmatpush.xpose.msk.msrb.mxu2 %vm196_vm2, %v313_v57 }
 0x181   :  { %456 = vmatpush.xpose.msk.msrb.mxu2 %vm196_vm2, %v312_v59 }
 0x185   :  { %457 = vmatpush.xpose.msk.msrb.mxu2 %vm196_vm2, %v311_v61 }
 0x189   :  { %458 = vmatpush.xpose.msk.msrb.mxu2 %vm196_vm2, %v310_v62 }
 0x18c   :  { %459 = vmatmul.msk.f32.vlgmr.msrb.gmra.mxu2 %vm196_vm2, %v326_v63 }
 0x20f   :  { %v402_v2 = vpop.f32.mrf.mxu2 }
 0x210   :  { %v403_v3 = vadd.f32 %v402_v2, %v333_v1 }
 0x212   :  { %405 = vst [vmem:[%s674_s7] sm:$0x1] %v403_v3 }

</bundles_post_ra>
